<compile_context>
chip_gen: v6e
topology: v6e:2x2x1
jax: 0.10.0
libtpu: 0.0.40
codegen_flags: <defaults>
</compile_context>

<pallas_src>
import functools

import jax
import jax.numpy as jnp
from jax.experimental import pallas as pl
from jax.experimental.pallas import tpu as pltpu


def _largest_tile(dim, unit, max_tile):
    """Largest multiple of `unit` that evenly divides `dim` and is <= max_tile.

    Falls back to the full dim (always a legal block extent) when impossible.
    """
    if dim % unit != 0:
        return dim
    cap = min(dim, max(unit, (max_tile // unit) * unit))
    t = cap
    while t >= unit:
        if dim % t == 0:
            return t
        t -= unit
    return dim


# ----------------------------------------------------------------------------
# Pass 1: channel-mean pooling  (B, C, HW) -> (B, 1, HW)  in f32
# ----------------------------------------------------------------------------
def _pool_kernel(x_ref, pool_ref, acc_ref, *, inv_c):
    ci = pl.program_id(2)

    @pl.when(ci == 0)
    def _init():
        acc_ref[...] = jnp.zeros_like(acc_ref)

    # Raw f32 sum over the channel tile (sublane reduction, XLU).
    acc_ref[...] += jnp.sum(x_ref[...].astype(jnp.float32), axis=1, keepdims=True)

    @pl.when(ci == pl.num_programs(2) - 1)
    def _finalize():
        pool_ref[...] = (acc_ref[...] * inv_c).astype(pool_ref.dtype)


def _channel_mean(x3):
    B, C, HW = x3.shape
    itemsize = jnp.dtype(x3.dtype).itemsize
    c_tile = _largest_tile(C, 8, 256)
    hw_tile = _largest_tile(
        HW, 128, max(512, (2 * 1024 * 1024) // max(1, itemsize * c_tile)))
    grid = (B, HW // hw_tile, C // c_tile)

    return pl.pallas_call(
        functools.partial(_pool_kernel, inv_c=1.0 / C),
        out_shape=jax.ShapeDtypeStruct((B, 1, HW), jnp.float32),
        grid=grid,
        in_specs=[pl.BlockSpec((1, c_tile, hw_tile),
                               lambda b, hwi, ci: (b, ci, hwi))],
        out_specs=pl.BlockSpec((1, 1, hw_tile),
                               lambda b, hwi, ci: (b, 0, hwi)),
        scratch_shapes=[pltpu.VMEM((1, 1, hw_tile), jnp.float32)],
        compiler_params=pltpu.CompilerParams(
            dimension_semantics=("parallel", "parallel", "arbitrary"),
            vmem_limit_bytes=32 * 1024 * 1024),
        cost_estimate=pl.CostEstimate(
            flops=int(B * C * HW),
            transcendentals=0,
            bytes_accessed=int(B * C * HW * itemsize + B * HW * 4)),
    )(x3)


# ----------------------------------------------------------------------------
# Pass 2: 1-channel k x k "same" convolution on the tiny pooled map
# ----------------------------------------------------------------------------
def _conv_kernel(w_ref, b_ref, pad_ref, out_ref, *, k, H, W):
    padv = pad_ref[...].astype(jnp.float32)            # (1, H+2p, W+2p)
    acc = jnp.zeros((1, H, W), jnp.float32) + b_ref[0]
    for di in range(k):                                 # static unrolled stencil
        for dj in range(k):
            acc = acc + w_ref[di, dj] * padv[:, di:di + H, dj:dj + W]
    out_ref[...] = acc


def _conv2d_same_1ch(pool_bhw, w, b):
    B, H, W = pool_bhw.shape
    k = w.shape[0]
    p = (k - 1) // 2
    padded = jnp.pad(pool_bhw, ((0, 0), (p, p), (p, p)))  # tiny, done in JAX
    Hp, Wp = H + 2 * p, W + 2 * p
    smem = pl.BlockSpec(memory_space=pltpu.MemorySpace.SMEM)

    return pl.pallas_call(
        functools.partial(_conv_kernel, k=k, H=H, W=W),
        out_shape=jax.ShapeDtypeStruct((B, H, W), jnp.float32),
        grid=(B,),
        in_specs=[smem, smem,
                  pl.BlockSpec((1, Hp, Wp), lambda bb: (bb, 0, 0))],
        out_specs=pl.BlockSpec((1, H, W), lambda bb: (bb, 0, 0)),
        compiler_params=pltpu.CompilerParams(
            dimension_semantics=("parallel",)),
        cost_estimate=pl.CostEstimate(
            flops=int(2 * B * H * W * k * k),
            transcendentals=0,
            bytes_accessed=int(B * Hp * Wp * 4 + B * H * W * 4)),
    )(w, b, padded)


# ----------------------------------------------------------------------------
# Pass 3: broadcast the (B, 1, HW) gate to (B, C, HW)  (store-only, no x read)
# ----------------------------------------------------------------------------
def _fill_kernel(g_ref, out_ref):
    out_ref[...] = jnp.broadcast_to(g_ref[...], out_ref.shape).astype(out_ref.dtype)


def _broadcast_gate(gate_b1hw, C, out_dtype):
    B, _, HW = gate_b1hw.shape
    itemsize = jnp.dtype(out_dtype).itemsize
    c_tile = _largest_tile(C, 8, 128)
    hw_tile = _largest_tile(
        HW, 128, max(512, (2 * 1024 * 1024) // max(1, itemsize * c_tile)))
    grid = (B, C // c_tile, HW // hw_tile)

    return pl.pallas_call(
        _fill_kernel,
        out_shape=jax.ShapeDtypeStruct((B, C, HW), out_dtype),
        grid=grid,
        in_specs=[pl.BlockSpec((1, 1, hw_tile),
                               lambda b, ci, hwi: (b, 0, hwi))],
        out_specs=pl.BlockSpec((1, c_tile, hw_tile),
                               lambda b, ci, hwi: (b, ci, hwi)),
        compiler_params=pltpu.CompilerParams(
            dimension_semantics=("parallel", "parallel", "parallel"),
            vmem_limit_bytes=32 * 1024 * 1024),
        cost_estimate=pl.CostEstimate(
            flops=0,
            transcendentals=0,
            bytes_accessed=int(B * HW * 4 + B * C * HW * itemsize)),
    )(gate_b1hw)


# ----------------------------------------------------------------------------
# Full forward
# ----------------------------------------------------------------------------
def spatial_attention(x, conv_w, conv_b):
    """x: (B, C, H, W). conv_w: (k, k) f32. conv_b: (1,) f32.

    Returns conv(mean_over_C(x)) repeated over the channel axis, shape
    (B, C, H, W), matching SpatialAttention.forward.
    """
    B, C, H, W = x.shape
    HW = H * W
    x3 = x.reshape(B, C, HW)                                  # lane-dense layout
    pool = _channel_mean(x3)                                  # (B, 1, HW) f32
    conv = _conv2d_same_1ch(pool.reshape(B, H, W), conv_w, conv_b)  # (B, H, W) f32
    out3 = _broadcast_gate(conv.reshape(B, 1, HW), C, x.dtype)      # (B, C, HW)
    return out3.reshape(B, C, H, W)


def make_params(key, kernel_size):
    """Conv2d(1, 1, kernel_size) parameters, stored as (k, k) weight + (1,) bias."""
    assert kernel_size % 2 == 1, "Odd kernel size required"
    k1, k2 = jax.random.split(key)
    w = jax.random.normal(k1, (kernel_size, kernel_size), jnp.float32) * 0.1
    b = jax.random.normal(k2, (1,), jnp.float32) * 0.1
    return w, b


def reference(x, conv_w, conv_b):
    """Pure-JAX reference for correctness check."""
    B, C, H, W = x.shape
    k = conv_w.shape[0]
    pool = jnp.mean(x.astype(jnp.float32), axis=1, keepdims=True)      # (B,1,H,W)
    conv = jax.lax.conv_general_dilated(
        pool, conv_w.reshape(1, 1, k, k), window_strides=(1, 1), padding="SAME",
        dimension_numbers=("NCHW", "OIHW", "NCHW")) + conv_b[0]
    return jnp.broadcast_to(conv, (B, C, H, W)).astype(x.dtype)


if __name__ == "__main__":
    key = jax.random.PRNGKey(0)
    kx, kp = jax.random.split(key)

    B, C, H, W = 2, 4, 16, 16
    kernel_size = 3

    x = jax.random.normal(kx, (B, C, H, W), jnp.float32)
    w, b = make_params(kp, kernel_size)

    out = spatial_attention(x, w, b)
    out = jax.block_until_ready(out)

    ref = reference(x, w, b)
    assert out.shape == (B, C, H, W)
    assert jnp.allclose(out, ref, atol=1e-5, rtol=1e-5), "mismatch vs reference"

    print("KERNEL_OK")
</pallas_src>

<mosaic_0001>
module attributes {stable_mosaic.version = 11 : i64} {
  func.func @_pool_kernel(%arg0: i32, %arg1: i32, %arg2: i32, %arg3: memref<1x4x256xf32, #tpu.memory_space<vmem>>, %arg4: memref<1x1x256xf32, #tpu.memory_space<vmem>>, %arg5: memref<1x1x256xf32, #tpu.memory_space<vmem>>) attributes {dimension_semantics = [#tpu.dimension_semantics<parallel>, #tpu.dimension_semantics<parallel>, #tpu.dimension_semantics<arbitrary>], iteration_bounds = array<i64: 2, 1, 1>, scalar_prefetch = 0 : i64, scratch_operands = 1 : i64, tpu.core_type = #tpu.core_type<tc>, window_params = [{transform_indices = @transform_0, window_bounds = array<i64: 1, 4, 256>}, {transform_indices = @transform_1, window_bounds = array<i64: 1, 1, 256>}]} {
    %c0_i32 = arith.constant 0 : i32
    %0 = arith.cmpi eq, %arg2, %c0_i32 : i32
    %1 = arith.extui %0 : i1 to i32
    %c0_i32_0 = arith.constant 0 : i32
    %2 = arith.cmpi ne, %1, %c0_i32_0 : i32
    scf.if %2 {
      %cst_11 = arith.constant 0.000000e+00 : f32
      %12 = vector.broadcast %cst_11 : f32 to vector<1x1x256xf32>
      %c0_12 = arith.constant 0 : index
      %c0_13 = arith.constant 0 : index
      %c0_14 = arith.constant 0 : index
      %13 = vector.load %arg5[%c0_12, %c0_13, %c0_14] : memref<1x1x256xf32, #tpu.memory_space<vmem>>, vector<1x1x256xf32>
      tpu.vector_store %arg5[%c0_12, %c0_13, %c0_14], %12 {strides = array<i32>} : memref<1x1x256xf32, #tpu.memory_space<vmem>>, vector<1x1x256xf32>,
    } else {
    }
    %c0 = arith.constant 0 : index
    %c0_1 = arith.constant 0 : index
    %c0_2 = arith.constant 0 : index
    %3 = vector.load %arg5[%c0, %c0_1, %c0_2] : memref<1x1x256xf32, #tpu.memory_space<vmem>>, vector<1x1x256xf32>
    %c0_3 = arith.constant 0 : index
    %c0_4 = arith.constant 0 : index
    %c0_5 = arith.constant 0 : index
    %4 = vector.load %arg3[%c0_3, %c0_4, %c0_5] : memref<1x4x256xf32, #tpu.memory_space<vmem>>, vector<1x4x256xf32>
    %cst = arith.constant dense<0.000000e+00> : vector<1x256xf32>
    %5 = vector.multi_reduction <add>, %4, %cst [1] : vector<1x4x256xf32> to vector<1x256xf32>
    %6 = vector.shape_cast %5 : vector<1x256xf32> to vector<1x1x256xf32>
    %7 = arith.addf %3, %6 : vector<1x1x256xf32>
    %c0_6 = arith.constant 0 : index
    %c0_7 = arith.constant 0 : index
    %c0_8 = arith.constant 0 : index
    %8 = vector.load %arg5[%c0_6, %c0_7, %c0_8] : memref<1x1x256xf32, #tpu.memory_space<vmem>>, vector<1x1x256xf32>
    tpu.vector_store %arg5[%c0_6, %c0_7, %c0_8], %7 {strides = array<i32>} : memref<1x1x256xf32, #tpu.memory_space<vmem>>, vector<1x1x256xf32>,
    %c0_i32_9 = arith.constant 0 : i32
    %9 = arith.cmpi eq, %arg2, %c0_i32_9 : i32
    %10 = arith.extui %9 : i1 to i32
    %c0_i32_10 = arith.constant 0 : i32
    %11 = arith.cmpi ne, %10, %c0_i32_10 : i32
    scf.if %11 {
      %c0_11 = arith.constant 0 : index
      %c0_12 = arith.constant 0 : index
      %c0_13 = arith.constant 0 : index
      %12 = vector.load %arg5[%c0_11, %c0_12, %c0_13] : memref<1x1x256xf32, #tpu.memory_space<vmem>>, vector<1x1x256xf32>
      %cst_14 = arith.constant 2.500000e-01 : f32
      %13 = vector.broadcast %cst_14 : f32 to vector<1x1x256xf32>
      %14 = arith.mulf %12, %13 : vector<1x1x256xf32>
      %c0_15 = arith.constant 0 : index
      %c0_16 = arith.constant 0 : index
      %c0_17 = arith.constant 0 : index
      %15 = vector.load %arg4[%c0_15, %c0_16, %c0_17] : memref<1x1x256xf32, #tpu.memory_space<vmem>>, vector<1x1x256xf32>
      tpu.vector_store %arg4[%c0_15, %c0_16, %c0_17], %14 {strides = array<i32>} : memref<1x1x256xf32, #tpu.memory_space<vmem>>, vector<1x1x256xf32>,
    } else {
    }
    return
  }
  func.func @transform_0(%arg0: i32, %arg1: i32, %arg2: i32) -> (i32, i32, i32) {
    %c0_i32 = arith.constant 0 : i32
    return %arg0, %arg2, %arg1 : i32, i32, i32
  }
  func.func @transform_1(%arg0: i32, %arg1: i32, %arg2: i32) -> (i32, i32, i32) {
    %c0_i32 = arith.constant 0 : i32
    %c0_i32_0 = arith.constant 0 : i32
    return %arg0, %c0_i32, %arg1 : i32, i32, i32
  }
}

</mosaic_0001>

<bundles_post_ra>
// kernel: tpu_custom_call.1
= control target key start
LH: loop header
LB: loop body
LE: loop exit
PB: predicated region body
PF: predicated region fallthrough
CT: control target
= control target key end

     0   :  { %6 = vsyncpa [#allocation4], 0  ;;  %s680_s0 = inlined_call_operand.hbm [shape: f32[2,4,256], index: 0, kind: input, shape index: {}]   ;;  %s681_s1 = inlined_call_operand.hbm [shape: f32[2,1,256], index: 1, kind: output, shape index: {}]  }
   0x1   :  { %8 = vsyncpa [#allocation4 + $0x1], 0 }
   0x2   :  { %9 = vsyncpa [#allocation5], 0 }
   0x3   :  { %11 = vsyncpa [#allocation5 + $0x1], 0  ;;  %s535_s6 = smov 0   ;;  %s537_s7 = smov 0  }
   0x4   :  { %s539_s8 = smov 0   ;;  %s541_s9 = smov 0  }
   0x5   :  { %s543_s10 = smov 0   ;;  %s545_s11 = smov 0  }
   0x6 LB: > { %s329_s12 = sadd.s32 4294967295, %s519_s11   ;;  %s330_s13 = sadd.s32 4294967294, %s519_s11   ;;  %s519_s11 = sphi %s545_s11, %s17_s11   ;;  %s515_s10 = sphi %s543_s10, %s695_s10   ;;  %s511_s9 = sphi %s541_s9, %s694_s9   ;;  %s507_s8 = sphi %s539_s8, %s693_s8   ;;  %s503_s7 = sphi %s537_s7, %s692_s7   ;;  %s499_s6 = sphi %s535_s6, %s691_s6  }
   0x7   : > { %s36_s14 = sadd.s32 1, %s515_s10  ;;  %s47_s15 = sadd.s32 1, %s507_s8 }
   0x8   : > { %p38_p0 = scmp.ge.s32.totalorder %s36_s14, 2  ;;  %p54_p1 = scmp.ne.s32.totalorder %s507_s8, %s503_s7 }
   0x9   : > { %p55_p2 = scmp.eq.s32.totalorder %s519_s11, 0  ;;  %p60_p3 = scmp.ne.s32.totalorder %s503_s7, %s499_s6 }
   0xa   : > { %s697_s14 = smov (%p38_p0, %s36_s14), 0  ;;  %p61_p5 = scmp.eq.s32.totalorder %s329_s12, 0 }
   0xb   : > { %p576_p4 = por %p55_p2, %p54_p1  ;;  %s40_s17 = ssub.s32 %s515_s10, %s697_s14 }
   0xc   : > { %p86_p6 = scmp.eq.s32.totalorder %s329_s12, 1  ;;  %p45_p7 = scmp.eq.s32.totalorder %s40_s17, 0 }
   0xd   : > { %p582_p8 = por %p61_p5, %p60_p3  ;;  %p92_p10 = scmp.eq.s32.totalorder %s330_s13, 1 }
   0xe   : > { %p586_p9 = por %p86_p6, %p54_p1  ;;  %p358_p13 = scmp.lt.s32.totalorder %s519_s11, 2 }
   0xf   : > { %s591_s20 = scalar_select %p45_p7, %s507_s8, %s47_s15  }
  0x10   : > { %p593_p11 = por %p92_p10, %p60_p3  ;;  %s112_s22 = sand.u32 1, %s507_s8  }
  0x11   : > { %s333_s23 = sshll.u32 %s112_s22, 3  ;;  %s344_s24 = sshll.u32 %s515_s10, 7 }
  0x12   : > { %s685_s21 = scalar_select %p593_p11, 1, 0 }
  0x13   : > { %s126_s27 = scalar_lea.hbm %s680_s0, %s344_s24  ;;  %s116_s28 = scalar_lea.vmem [#allocation3], %s333_s23 }
  0x14   : > { %s128_s29 = sshll.u32 %s116_s28, 4  ;;  %p606_p0 = pnand %p358_p13, %p576_p4  ;;  %s129_s29 = int_to_ptr.vmem [resolvable:$true] %s128_s29 }
  0x15   : > { %p336_p1 = scmp.ge.s32.totalorder %s519_s11, 1  ;;  %p133_p2 = scmp.lt.s32.totalorder %s519_s11, 3 }
  0x16   : > { %s113_s2 = scalar_lea.sflag [#allocation4], %s112_s22  ;;  %p413_p3 = pneg %p606_p0 }
  0x17   : > { %s424_s3 = scalar_lea.vmem %s129_s29, 128  ;;  %s521_s4 = smov [#allocation3]  }
  0x18   : > { %p425_p5 = scmp.ne.s32.totalorder %s129_s29, %s424_s3  ;;  %s429_s5 = sshll.u32 %s521_s4, 4  ;;  %s430_s5 = int_to_ptr.vmem [resolvable:$false] %s429_s5 }
  0x19   : > { %s431_s12 = scalar_lea.vmem %s430_s5, 256  ;;  %p432_p10 = scmp.lt.s32.totalorder %s129_s29, %s430_s5 }
  0x1a   : > { %p427_p6 = pnand %p425_p5, %p413_p3  ;;  %p433_p12 = scmp.lt.s32.totalorder %s431_s12, %s424_s3 }
  0x1c   : > { %p428_p7 = pneg %p427_p6  ;;  %p434_p4 = por %p433_p12, %p432_p10 }
  0x1e   : > { %p435_p13 = pnand %p434_p4, %p428_p7 }
  0x20   : > { %438 = shalt.err (!%p435_p13)
}
  0x21   : > { %353 = dma.hbm_to_vmem [thread:$0]  (!%p606_p0), %s126_s27, 128, %s129_s29, %s113_s2  }
  0x22   : > { %p134_p11 = pnand %p336_p1, %p133_p2 }
  0x23   : > { %s621_s13 = sand.u32 (!%p134_p11), 1, %s503_s7  }
  0x24   : > { %137 = sbr.rel (%p134_p11) target bundleno = 89 (0x59), region = 24  ;;  %s337_s15 = sshll.u32 (!%p134_p11), %s621_s13, 3 }
  0x25   : > { %s140_s16 = scalar_lea.sflag (!%p134_p11), [#allocation4], %s621_s13  ;;  %s143_s17 = scalar_lea.vmem (!%p134_p11), [#allocation3], %s337_s15 }
  0x29   : > { %490 = dma.done.wait (%p582_p8), %s140_s16, 128  }
  0x2a   : > { %492 = vsyncadd (%p582_p8), %s140_s16, 4294967168  ;;  %v168_v0 = vlaneseq  ;;  %v522_v2 = vmov 0.0   ;;  %vm178_vm1 = vcmask 1043456   ;;  %v174_v3 = vld [vmem:[%s143_s17] sm:$0xff]  ;;  %v523_v12 = vmov 1966171168  }
  0x2b   : > { %v176_v4 = vcombine.high %v174_v3, %v174_v3  ;;  %v179_v5 = vsel %vm178_vm1, %v174_v3, 0.0  ;;  %v197_v13 = vunpack.c.l.s4 %v523_v12  ;;  %s338_s18 = sshll.u32 %s621_s13, 1  ;;  %s345_s24 = sshll.u32 %s511_s9, 5 }
  0x2c   : > { %vm629_vm0 = vcmp.lt.s32.totalorder %v168_v0, 256  ;;  %v180_v6 = vrot.slane %v179_v5, 4  ;;  %v200_v19 = vshrl.u32 %v168_v0, 7  ;;  %s161_s22 = scalar_lea.vmem [#allocation6], %s338_s18  ;;  %s238_s27 = scalar_lea.hbm %s681_s1, %s345_s24 }
  0x2d   : > { %172 = vst.msk [vmem:[#allocation2] sm:$0x3] %vm629_vm0, %v522_v2  ;;  %v186_v7 = vsel %vm178_vm1, %v176_v4, 0.0  ;;  %v198_v18 = vunpack.c.0.s8 %v197_v13  ;;  %s240_s23 = sshll.u32 %s161_s22, 4  ;;  %s224_s28 = scalar_lea.sflag [#allocation5], %s621_s13  ;;  %s241_s23 = int_to_ptr.vmem [resolvable:$true] %s240_s23 }
  0x2e   : > { %v181_v8 = vadd.f32 %v180_v6, %v179_v5  ;;  %v187_v9 = vrot.slane %v186_v7, 4  ;;  %s439_s29 = scalar_lea.vmem %s241_s23, 32  ;;  %s524_s30 = smov [#allocation6]  }
  0x2f   : > { %v201_v23 = vsub.s32 %v198_v18, %v200_v19  ;;  %p440_p8 = scmp.ne.s32.totalorder %s241_s23, %s439_s29  ;;  %s443_s2 = sshll.u32 %s524_s30, 4  ;;  %s444_s2 = int_to_ptr.vmem [resolvable:$false] %s443_s2 }
  0x30   : > { %v182_v10 = vrot.slane %v181_v8, 2  ;;  %v188_v11 = vadd.f32 %v187_v9, %v186_v7  ;;  %s445_s9 = scalar_lea.vmem %s444_s2, 64  ;;  %p446_p0 = scmp.lt.s32.totalorder %s241_s23, %s444_s2 }
  0x31   : > { %p441_p11 = pnand %p440_p8, %p586_p9  ;;  %p447_p1 = scmp.lt.s32.totalorder %s445_s9, %s439_s29 }
  0x32   : > { %v183_v14 = vadd.f32 %v182_v10, %v181_v8  ;;  %v189_v15 = vrot.slane %v188_v11, 2 }
  0x33   : > { %p442_p12 = pneg %p441_p11  ;;  %p448_p2 = por %p447_p1, %p446_p0 }
  0x34   : > { %v184_v16 = vrot.slane %v183_v14, 1  ;;  %v190_v17 = vadd.f32 %v189_v15, %v188_v11  ;;  %v173_v26 = vld [vmem:[#allocation2] sm:$0x3] }
  0x35   : > { %p449_p3 = pnand %p448_p2, %p442_p12 }
  0x36   : > { %v185_v20 = vadd.f32 %v184_v16, %v183_v14  ;;  %v191_v21 = vrot.slane %v190_v17, 1 }
  0x38   : > { %v192_v22 = vadd.f32 %v191_v21, %v190_v17 }
  0x3a   : > { %v195_v24 = vcombine.low %v185_v20, %v192_v22 }
  0x3c   : > { %v202_v25 = vrot.slane %v195_v24, %v201_v23 }
  0x3e   : > { %v209_v27 = vrot.slane %v202_v25, %v201_v23 }
  0x40   : > { %v211_v28 = vadd.f32 %v209_v27, %v173_v26 }
  0x42   : > { %216 = vst.msk [vmem:[#allocation2] sm:$0x3] %vm629_vm0, %v211_v28 }
  0x49   : > { %v220_v29 = vld [vmem:[#allocation2] sm:$0x3] }
  0x4a   : > { %v221_v30 = vmul.f32 0.25, %v220_v29 }
  0x4c   : > { %222 = vst.msk [vmem:[%s161_s22] sm:$0x3] %vm629_vm0, %v221_v30 }
  0x4d   : > { %452 = shalt.err (!%p449_p3)
}
  0x4e   : > { %s453_s3 = scalar_lea.hbm %s238_s27, 32  ;;  %s457_s12 = scalar_lea.hbm %s681_s1, 64 }
  0x4f   : > { %p454_p5 = scmp.ne.s32.totalorder %s238_s27, %s453_s3  ;;  %p458_p10 = scmp.lt.s32.totalorder %s238_s27, %s681_s1 }
  0x50   : > { %p459_p4 = scmp.lt.s32.totalorder %s457_s12, %s453_s3 }
  0x51   : > { %p455_p6 = pnand %p454_p5, %p586_p9 }
  0x52   : > { %p460_p13 = por %p459_p4, %p458_p10 }
  0x53   : > { %p456_p7 = pneg %p455_p6 }
  0x55   : > { %p461_p8 = pnand %p460_p13, %p456_p7 }
  0x57   : > { %464 = shalt.err (!%p461_p8)
}
  0x58   : > { %348 = dma.vmem_to_hbm [thread:$0]  (%p586_p9), %s241_s23, 32, %s238_s27, %s224_s28  }
  0x59 PF: > { %s252_s16 = sand.u32 1, %s499_s6   ;;  %p689_p11 = scmp.ne.s32.totalorder %s685_s21, 0 }
  0x5a   : > { %p690_p12 = scmp.ge.s32.totalorder %s519_s11, 2  ;;  %s253_s17 = scalar_lea.sflag [#allocation5], %s252_s16 }
  0x5c   : > { %p355_p0 = pnand %p690_p12, %p689_p11 }
  0x5e   : > { %p356_p1 = pneg %p355_p0 }
  0x60   : > { %494 = dma.done.wait (%p356_p1), %s253_s17, 32  }
  0x61   : > { %496 = vsyncadd (%p356_p1), %s253_s17, 4294967264  ;;  %s17_s11 = sadd.s32 1, %s519_s11   ;;  %s691_s6 = smov %s503_s7 }
  0x62   : > { %p14_p2 = scmp.ge.s32.totalorder %s17_s11, 4   ;;  %s692_s7 = smov %s507_s8 }
  0x63   : > { %s693_s8 = smov %s591_s20  ;;  %s694_s9 = smov %s515_s10 }
  0x64   : > { %s695_s10 = smov %s697_s14  ;;  %16 = sbr.rel (!%p14_p2) target bundleno = 6 (0x6), region = 77 }
  0x69   :  { %258 = vsyncpa [#allocation4], 1 }
  0x6a   :  { %260 = vsyncpa [#allocation4 + $0x1], 1 }
  0x6b   :  { %261 = vsyncpa [#allocation5], 1 }
  0x6c   :  { %263 = vsyncpa [#allocation5 + $0x1], 1 }

</bundles_post_ra>
